<compile_context>
chip_gen: v7x
topology: tpu7x:2x2x1
jax: 0.10.0
libtpu: 0.0.40
codegen_flags: <defaults>
</compile_context>

<pallas_src>
import jax
import jax.numpy as jnp
from jax.experimental import pallas as pl
from jax.experimental.pallas import tpu as pltpu

NUM_AGENTS = 5
NUM_AGENTS_PAD = 8          # pad agent axis to a sublane multiple
BIAS_STRENGTH = 0.15


# -----------------------------------------------------------------------------
# Tiling helpers.
# -----------------------------------------------------------------------------
def _pad_to(x, m):
    return ((x + m - 1) // m) * m


def _choose_tile(dim, candidates):
    for c in candidates:
        if c <= dim and dim % c == 0:
            return c
    # TODO(synk): only reachable for tiny/odd dims; large dims are padded by
    # the callers below before tiles are chosen.
    return dim


def _pick_tile_and_pad(dim, max_tile, align):
    tile = min(max_tile, _pad_to(dim, align))
    return tile, _pad_to(dim, tile)


# -----------------------------------------------------------------------------
# Kernel A: S-tiled emotion pooling + unmasked context mean + per-token agent
# gate.  Reduction over the sequence axis with scratch accumulators and a
# pl.when finalize; the gate matmul is fused so `hidden` is read from HBM once.
# -----------------------------------------------------------------------------
def _emotion_gate_kernel_factory(seq_len):
    inv_s = 1.0 / float(seq_len)

    def kernel(h_ref, m_ref, we_ref, be_ref, gw_ref,
               emo_ref, ctx_ref, gate_ref,
               msum_ref, mcnt_ref, usum_ref):
        s = pl.program_id(0)

        @pl.when(s == 0)
        def _():
            msum_ref[...] = jnp.zeros_like(msum_ref)
            mcnt_ref[...] = jnp.zeros_like(mcnt_ref)
            usum_ref[...] = jnp.zeros_like(usum_ref)

        h = h_ref[...]                                   # (B, ts, H) f32
        m = m_ref[...]                                   # (B, ts)    f32
        msum_ref[...] += jnp.sum(h * m[:, :, None], axis=1)      # masked sum
        mcnt_ref[...] += jnp.sum(m, axis=1, keepdims=True)       # mask count
        usum_ref[...] += jnp.sum(h, axis=1)                      # unmasked sum

        # Per-token agent gate (grid-invariant per-token work, fused here so
        # the lm-head kernel never recomputes it per vocab tile).
        g = jnp.einsum("bsh,ha->bsa", h, gw_ref[...],
                       preferred_element_type=jnp.float32)       # (B, ts, A_pad)
        gate_ref[...] = 1.0 / (1.0 + jnp.exp(-g))

        @pl.when(s == pl.num_programs(0) - 1)
        def _():
            pooled = msum_ref[...] / jnp.maximum(mcnt_ref[...], 1.0)   # (B, H)
            emo_ref[...] = jnp.tanh(
                jnp.dot(pooled, we_ref[...],
                        preferred_element_type=jnp.float32) + be_ref[...])
            # matches `context.mean(dim=1)` (unmasked) in _update_agent_weights
            ctx_ref[...] = usum_ref[...] * inv_s

    return kernel


def emotion_gate_and_context(hidden, mask_f, emo_w, emo_b, gate_w_pad):
    B, S, H = hidden.shape
    E = emo_w.shape[1]
    A_pad = gate_w_pad.shape[1]
    # TODO(synk): for very large B*H reduce ts further / pad S so the per-step
    # (B, ts, H) block stays within the scoped VMEM budget.
    ts = _choose_tile(S, (512, 256, 128, 64, 32, 16, 8))

    return pl.pallas_call(
        _emotion_gate_kernel_factory(S),
        out_shape=(jax.ShapeDtypeStruct((B, E), jnp.float32),
                   jax.ShapeDtypeStruct((B, H), jnp.float32),
                   jax.ShapeDtypeStruct((B, S, A_pad), jnp.float32)),
        grid_spec=pltpu.PrefetchScalarGridSpec(
            num_scalar_prefetch=0,
            grid=(S // ts,),
            in_specs=[
                pl.BlockSpec((B, ts, H), lambda s: (0, s, 0)),   # hidden tile
                pl.BlockSpec((B, ts), lambda s: (0, s)),         # mask tile
                pl.BlockSpec((H, E), lambda s: (0, 0)),          # emotion proj
                pl.BlockSpec((1, E), lambda s: (0, 0)),          # emotion bias
                pl.BlockSpec((H, A_pad), lambda s: (0, 0)),      # gate weights
            ],
            out_specs=[
                pl.BlockSpec((B, E), lambda s: (0, 0)),          # emotion (resident)
                pl.BlockSpec((B, H), lambda s: (0, 0)),          # ctx mean (resident)
                pl.BlockSpec((B, ts, A_pad), lambda s: (0, s, 0)),  # per-token gate
            ],
            scratch_shapes=[pltpu.VMEM((B, H), jnp.float32),     # masked sum
                            pltpu.VMEM((B, 1), jnp.float32),     # mask count
                            pltpu.VMEM((B, H), jnp.float32)],    # unmasked sum
        ),
        compiler_params=pltpu.CompilerParams(
            dimension_semantics=("arbitrary",)),
    )(hidden, mask_f, emo_w, emo_b, gate_w_pad)


# -----------------------------------------------------------------------------
# Kernel B: fused LM head + multi-agent frequency-bias blend as a single
# bf16 MXU dot with an f32 accumulator.
#   logits = [hidden, scale] @ [lm_head ; freq_bias]
# Grid is vocab-OUTER / token-INNER so the big weight tile stays resident and
# only the small hidden tiles are re-streamed.
# -----------------------------------------------------------------------------
def lm_head_blend_kernel(x_ref, w_ref, out_ref):
    out_ref[...] = jnp.dot(x_ref[...], w_ref[...],
                           preferred_element_type=jnp.float32).astype(out_ref.dtype)


def lm_head_blend(x_cat, w_cat, vocab, *, out_dtype=jnp.bfloat16):
    T, Kc = x_cat.shape
    Kc_w, V_pad = w_cat.shape
    assert Kc == Kc_w

    tm, T_pad = _pick_tile_and_pad(T, 512, 8)            # token tile (v6e-friendly)
    if T_pad != T:
        x_cat = jnp.pad(x_cat, ((0, T_pad - T), (0, 0)))
    tn = _choose_tile(V_pad, (1024, 512, 256, 128))      # V_pad is a 128-multiple

    out = pl.pallas_call(
        lm_head_blend_kernel,
        out_shape=jax.ShapeDtypeStruct((T_pad, V_pad), out_dtype),
        grid_spec=pltpu.PrefetchScalarGridSpec(
            num_scalar_prefetch=0,
            # vocab OUTER, token INNER: w_cat tile constant across the inner
            # axis (fetched once per outer step); hidden tiles are the ones
            # re-streamed -> ~tn/tm less HBM read traffic.
            grid=(V_pad // tn, T_pad // tm),
            in_specs=[
                pl.BlockSpec((tm, Kc), lambda j, i: (i, 0)),   # hidden+scale rows
                pl.BlockSpec((Kc, tn), lambda j, i: (0, j)),   # lm_head+bias cols
            ],
            out_specs=pl.BlockSpec((tm, tn), lambda j, i: (i, j)),
        ),
        compiler_params=pltpu.CompilerParams(
            dimension_semantics=("parallel", "parallel"),
            # v5e scoped default (16 MiB) is too small for tm=512/tn=1024 at
            # real H; stay well under v7x's 64 MiB/TC physical VMEM.
            vmem_limit_bytes=48 * 1024 * 1024),
    )(x_cat, w_cat)
    return out[:T, :vocab]


# -----------------------------------------------------------------------------
# Frozen-weight prep: done ONCE at init (no per-call bf16 casts of lm_head).
# -----------------------------------------------------------------------------
def build_blend_weights(lm_head, freq_bias):
    H, V = lm_head.shape
    A = freq_bias.shape[0]
    _, v_pad = _pick_tile_and_pad(V, 1024, 128)          # pad vocab to tile multiple
    lm = jnp.pad(lm_head, ((0, 0), (0, v_pad - V)))
    fb = jnp.pad(freq_bias, ((0, NUM_AGENTS_PAD - A), (0, v_pad - V)))
    return jnp.concatenate([lm, fb], axis=0).astype(jnp.bfloat16)   # (H+8, v_pad)


# -----------------------------------------------------------------------------
# Agent-weight update (tiny A=5 math -> plain JAX glue).
# -----------------------------------------------------------------------------
def update_agent_weights(emotion, ctx_mean, agent_w, emo2agent, dl_wa, dl_wc, dl_b):
    affinity = jax.nn.softmax(emotion @ emo2agent, axis=-1).mean(axis=0)   # (A,)
    decay_logit = jnp.dot(agent_w, dl_wa) + ctx_mean @ dl_wc + dl_b        # (B,)
    decay_rate = jax.nn.sigmoid(decay_logit).mean()
    new_w = decay_rate * agent_w + (1.0 - decay_rate) * affinity
    new_w = new_w / jnp.sum(new_w)
    # TODO(synk): agent_baselines buffer update (stateful, does not affect the
    # returned outputs) is not reproduced here.
    return new_w


# -----------------------------------------------------------------------------
# Full forward (mirrors MultiAgentQwen.forward with use_emotion_routing=True,
# return_all_agents=False; head routing is inactive in the reference forward).
# -----------------------------------------------------------------------------
def multi_agent_qwen_forward(params, input_ids, attention_mask):
    # synthetic frozen "base model" -> final hidden states (plain-JAX glue)
    h = params["embed"][input_ids]                                    # (B, S, H)
    h = h + jnp.tanh(h @ params["mlp_w1"]) @ params["mlp_w2"]
    mu = h.mean(-1, keepdims=True)
    var = h.var(-1, keepdims=True)
    hidden_states = (h - mu) / jnp.sqrt(var + 1e-6)                   # (B, S, H)

    mask_f = attention_mask.astype(jnp.float32)
    emotion, ctx_mean, gate = emotion_gate_and_context(
        hidden_states, mask_f, params["emo_w"], params["emo_b"],
        params["gate_w_pad"])

    new_w = update_agent_weights(
        emotion, ctx_mean, params["agent_weights"], params["emo2agent"],
        params["dl_wa"], params["dl_wc"], params["dl_b"])

    B, S, H = hidden_states.shape
    T = B * S
    hidden2d = hidden_states.reshape(T, H)
    gate2d = gate.reshape(T, NUM_AGENTS_PAD)

    # Pre-combine blend weights + gate into a per-token scale; padded agent
    # columns carry zero weight so they contribute nothing.
    new_w_pad = jnp.pad(new_w, (0, NUM_AGENTS_PAD - NUM_AGENTS))
    scale = (BIAS_STRENGTH * new_w_pad)[None, :] * gate2d             # (T, 8)

    # Fuse base-logit and bias dots into one MXU dot by concatenating along K.
    # (Extra T*(H+8) bf16 build traffic is negligible vs the lm_head stream.)
    x_cat = jnp.concatenate([hidden2d.astype(jnp.bfloat16),
                             scale.astype(jnp.bfloat16)], axis=1)     # (T, H+8)

    final_logits = lm_head_blend(x_cat, params["w_cat"], params["vocab"])

    return {
        "logits": final_logits.reshape(B, S, -1),     # bf16; f32-accumulated
        "emotion_vector": emotion,
        "agent_weights": new_w,
        "hidden_states": hidden_states,
        "all_agent_logits": None,
    }


# -----------------------------------------------------------------------------
# Deterministic parameter construction + demo.
# -----------------------------------------------------------------------------
def init_params(key, *, vocab, hidden, emo_dim, num_agents):
    ks = jax.random.split(key, 10)
    lm_head = 0.05 * jax.random.normal(ks[3], (hidden, vocab), jnp.float32)
    freq_bias = 0.1 * jax.random.normal(ks[6], (num_agents, vocab), jnp.float32)
    gate_w = 0.1 * jax.random.normal(ks[7], (hidden, num_agents), jnp.float32)
    return {
        "embed": 0.02 * jax.random.normal(ks[0], (vocab, hidden), jnp.float32),
        "mlp_w1": 0.05 * jax.random.normal(ks[1], (hidden, hidden), jnp.float32),
        "mlp_w2": 0.05 * jax.random.normal(ks[2], (hidden, hidden), jnp.float32),
        "emo_w": 0.1 * jax.random.normal(ks[4], (hidden, emo_dim), jnp.float32),
        "emo_b": jnp.zeros((1, emo_dim), jnp.float32),
        "emo2agent": 0.1 * jax.random.normal(ks[5], (emo_dim, num_agents), jnp.float32),
        "gate_w_pad": jnp.pad(gate_w, ((0, 0), (0, NUM_AGENTS_PAD - num_agents))),
        "dl_wa": 0.1 * jax.random.normal(ks[8], (num_agents,), jnp.float32),
        "dl_wc": 0.1 * jax.random.normal(ks[9], (hidden,), jnp.float32),
        "dl_b": jnp.float32(0.0),
        "agent_weights": jnp.ones((num_agents,), jnp.float32) / num_agents,
        # frozen weights stored bf16 / pre-concatenated exactly once
        "w_cat": build_blend_weights(lm_head, freq_bias),
        "vocab": vocab,
    }


if __name__ == "__main__":
    B, S, H, V, E, A = 2, 8, 32, 512, 64, NUM_AGENTS

    key = jax.random.PRNGKey(0)
    k_param, k_ids = jax.random.split(key)
    params = init_params(k_param, vocab=V, hidden=H, emo_dim=E, num_agents=A)

    input_ids = jax.random.randint(k_ids, (B, S), 0, V, dtype=jnp.int32)
    attention_mask = jnp.ones((B, S), jnp.int32)

    out = multi_agent_qwen_forward(params, input_ids, attention_mask)
    jax.block_until_ready((out["logits"], out["emotion_vector"],
                           out["agent_weights"], out["hidden_states"]))

    assert out["logits"].shape == (B, S, V)
    assert out["emotion_vector"].shape == (B, E)
    assert out["agent_weights"].shape == (A,)
    assert out["hidden_states"].shape == (B, S, H)
    print("KERNEL_OK")
</pallas_src>

<mosaic_0001>
module attributes {stable_mosaic.version = 11 : i64} {
  func.func @kernel(%arg0: i32, %arg1: memref<2x8x32xf32, #tpu.memory_space<vmem>>, %arg2: memref<2x8xf32, #tpu.memory_space<vmem>>, %arg3: memref<32x64xf32, #tpu.memory_space<vmem>>, %arg4: memref<1x64xf32, #tpu.memory_space<vmem>>, %arg5: memref<32x8xf32, #tpu.memory_space<vmem>>, %arg6: memref<2x64xf32, #tpu.memory_space<vmem>>, %arg7: memref<2x32xf32, #tpu.memory_space<vmem>>, %arg8: memref<2x8x8xf32, #tpu.memory_space<vmem>>, %arg9: memref<2x32xf32, #tpu.memory_space<vmem>>, %arg10: memref<2x1xf32, #tpu.memory_space<vmem>>, %arg11: memref<2x32xf32, #tpu.memory_space<vmem>>) attributes {dimension_semantics = [#tpu.dimension_semantics<arbitrary>], iteration_bounds = array<i64: 1>, scalar_prefetch = 0 : i64, scratch_operands = 3 : i64, tpu.core_type = #tpu.core_type<tc>, window_params = [{transform_indices = @transform_0, window_bounds = array<i64: 2, 8, 32>}, {transform_indices = @transform_1, window_bounds = array<i64: 2, 8>}, {pipeline_mode = #tpu.pipeline_mode<synchronous>, transform_indices = @transform_2, window_bounds = array<i64: 32, 64>}, {pipeline_mode = #tpu.pipeline_mode<synchronous>, transform_indices = @transform_3, window_bounds = array<i64: 1, 64>}, {pipeline_mode = #tpu.pipeline_mode<synchronous>, transform_indices = @transform_4, window_bounds = array<i64: 32, 8>}, {pipeline_mode = #tpu.pipeline_mode<synchronous>, transform_indices = @transform_5, window_bounds = array<i64: 2, 64>}, {pipeline_mode = #tpu.pipeline_mode<synchronous>, transform_indices = @transform_6, window_bounds = array<i64: 2, 32>}, {transform_indices = @transform_7, window_bounds = array<i64: 2, 8, 8>}]} {
    %c0_i32 = arith.constant 0 : i32
    %0 = arith.cmpi eq, %arg0, %c0_i32 : i32
    %1 = arith.extui %0 : i1 to i32
    %c0_i32_0 = arith.constant 0 : i32
    %2 = arith.cmpi ne, %1, %c0_i32_0 : i32
    scf.if %2 {
      %cst_30 = arith.constant 0.000000e+00 : f32
      %34 = vector.broadcast %cst_30 : f32 to vector<2x32xf32>
      %c0_31 = arith.constant 0 : index
      %c0_32 = arith.constant 0 : index
      %35 = vector.load %arg9[%c0_31, %c0_32] : memref<2x32xf32, #tpu.memory_space<vmem>>, vector<2x32xf32>
      tpu.vector_store %arg9[%c0_31, %c0_32], %34 {strides = array<i32>} : memref<2x32xf32, #tpu.memory_space<vmem>>, vector<2x32xf32>,
      %cst_33 = arith.constant 0.000000e+00 : f32
      %36 = vector.broadcast %cst_33 : f32 to vector<2x1xf32>
      %c0_34 = arith.constant 0 : index
      %c0_35 = arith.constant 0 : index
      %37 = vector.load %arg10[%c0_34, %c0_35] : memref<2x1xf32, #tpu.memory_space<vmem>>, vector<2x1xf32>
      tpu.vector_store %arg10[%c0_34, %c0_35], %36 {strides = array<i32>} : memref<2x1xf32, #tpu.memory_space<vmem>>, vector<2x1xf32>,
      %cst_36 = arith.constant 0.000000e+00 : f32
      %38 = vector.broadcast %cst_36 : f32 to vector<2x32xf32>
      %c0_37 = arith.constant 0 : index
      %c0_38 = arith.constant 0 : index
      %39 = vector.load %arg11[%c0_37, %c0_38] : memref<2x32xf32, #tpu.memory_space<vmem>>, vector<2x32xf32>
      tpu.vector_store %arg11[%c0_37, %c0_38], %38 {strides = array<i32>} : memref<2x32xf32, #tpu.memory_space<vmem>>, vector<2x32xf32>,
    } else {
    }
    %c0 = arith.constant 0 : index
    %c0_1 = arith.constant 0 : index
    %c0_2 = arith.constant 0 : index
    %3 = vector.load %arg1[%c0, %c0_1, %c0_2] : memref<2x8x32xf32, #tpu.memory_space<vmem>>, vector<2x8x32xf32>
    %c0_3 = arith.constant 0 : index
    %c0_4 = arith.constant 0 : index
    %4 = vector.load %arg2[%c0_3, %c0_4] : memref<2x8xf32, #tpu.memory_space<vmem>>, vector<2x8xf32>
    %c0_5 = arith.constant 0 : index
    %c0_6 = arith.constant 0 : index
    %5 = vector.load %arg9[%c0_5, %c0_6] : memref<2x32xf32, #tpu.memory_space<vmem>>, vector<2x32xf32>
    %6 = vector.shape_cast %4 : vector<2x8xf32> to vector<2x8x1xf32>
    %7 = vector.broadcast %6 : vector<2x8x1xf32> to vector<2x8x32xf32>
    %8 = arith.mulf %3, %7 : vector<2x8x32xf32>
    %cst = arith.constant dense<0.000000e+00> : vector<2x32xf32>
    %9 = vector.multi_reduction <add>, %8, %cst [1] : vector<2x8x32xf32> to vector<2x32xf32>
    %10 = arith.addf %5, %9 : vector<2x32xf32>
    %c0_7 = arith.constant 0 : index
    %c0_8 = arith.constant 0 : index
    %11 = vector.load %arg9[%c0_7, %c0_8] : memref<2x32xf32, #tpu.memory_space<vmem>>, vector<2x32xf32>
    tpu.vector_store %arg9[%c0_7, %c0_8], %10 {strides = array<i32>} : memref<2x32xf32, #tpu.memory_space<vmem>>, vector<2x32xf32>,
    %c0_9 = arith.constant 0 : index
    %c0_10 = arith.constant 0 : index
    %12 = vector.load %arg10[%c0_9, %c0_10] : memref<2x1xf32, #tpu.memory_space<vmem>>, vector<2x1xf32>
    %cst_11 = arith.constant dense<0.000000e+00> : vector<2xf32>
    %13 = vector.multi_reduction <add>, %4, %cst_11 [1] : vector<2x8xf32> to vector<2xf32>
    %14 = vector.shape_cast %13 : vector<2xf32> to vector<2x1xf32>
    %15 = arith.addf %12, %14 : vector<2x1xf32>
    %c0_12 = arith.constant 0 : index
    %c0_13 = arith.constant 0 : index
    %16 = vector.load %arg10[%c0_12, %c0_13] : memref<2x1xf32, #tpu.memory_space<vmem>>, vector<2x1xf32>
    tpu.vector_store %arg10[%c0_12, %c0_13], %15 {strides = array<i32>} : memref<2x1xf32, #tpu.memory_space<vmem>>, vector<2x1xf32>,
    %c0_14 = arith.constant 0 : index
    %c0_15 = arith.constant 0 : index
    %17 = vector.load %arg11[%c0_14, %c0_15] : memref<2x32xf32, #tpu.memory_space<vmem>>, vector<2x32xf32>
    %cst_16 = arith.constant dense<0.000000e+00> : vector<2x32xf32>
    %18 = vector.multi_reduction <add>, %3, %cst_16 [1] : vector<2x8x32xf32> to vector<2x32xf32>
    %19 = arith.addf %17, %18 : vector<2x32xf32>
    %c0_17 = arith.constant 0 : index
    %c0_18 = arith.constant 0 : index
    %20 = vector.load %arg11[%c0_17, %c0_18] : memref<2x32xf32, #tpu.memory_space<vmem>>, vector<2x32xf32>
    tpu.vector_store %arg11[%c0_17, %c0_18], %19 {strides = array<i32>} : memref<2x32xf32, #tpu.memory_space<vmem>>, vector<2x32xf32>,
    %c0_19 = arith.constant 0 : index
    %c0_20 = arith.constant 0 : index
    %21 = vector.load %arg5[%c0_19, %c0_20] : memref<32x8xf32, #tpu.memory_space<vmem>>, vector<32x8xf32>
    "tpu.trace_start"() <{level = 10 : i32, message = "bsh,ha->bsa"}> : () -> ()
    %cst_21 = arith.constant dense<0.000000e+00> : vector<2x8x8xf32>
    %22 = tpu.matmul %3, %21, %cst_21 {dimension_numbers = #tpu.dot_dimension_numbers<[2], [0], [0, 1], [1], [0, 0, 0, 1, 1, 1], [], []>} : vector<2x8x32xf32>, vector<32x8xf32>, vector<2x8x8xf32> -> vector<2x8x8xf32>
    "tpu.trace_stop"() : () -> ()
    %cst_22 = arith.constant 0.000000e+00 : f32
    %23 = vector.broadcast %cst_22 : f32 to vector<2x8x8xf32>
    %24 = arith.subf %23, %22 : vector<2x8x8xf32>
    %25 = math.exp %24 : vector<2x8x8xf32>
    %cst_23 = arith.constant 1.000000e+00 : f32
    %26 = vector.broadcast %cst_23 : f32 to vector<2x8x8xf32>
    %27 = arith.addf %26, %25 : vector<2x8x8xf32>
    %cst_24 = arith.constant 1.000000e+00 : f32
    %28 = vector.broadcast %cst_24 : f32 to vector<2x8x8xf32>
    %29 = arith.divf %28, %27 : vector<2x8x8xf32>
    %c0_25 = arith.constant 0 : index
    %c0_26 = arith.constant 0 : index
    %c0_27 = arith.constant 0 : index
    %30 = vector.load %arg8[%c0_25, %c0_26, %c0_27] : memref<2x8x8xf32, #tpu.memory_space<vmem>>, vector<2x8x8xf32>
    tpu.vector_store %arg8[%c0_25, %c0_26, %c0_27], %29 {strides = array<i32>} : memref<2x8x8xf32, #tpu.memory_space<vmem>>, vector<2x8x8xf32>,
    %c0_i32_28 = arith.constant 0 : i32
    %31 = arith.cmpi eq, %arg0, %c0_i32_28 : i32
    %32 = arith.extui %31 : i1 to i32
    %c0_i32_29 = arith.constant 0 : i32
    %33 = arith.cmpi ne, %32, %c0_i32_29 : i32
    scf.if %33 {
      %c0_30 = arith.constant 0 : index
      %c0_31 = arith.constant 0 : index
      %34 = vector.load %arg9[%c0_30, %c0_31] : memref<2x32xf32, #tpu.memory_space<vmem>>, vector<2x32xf32>
      %c0_32 = arith.constant 0 : index
      %c0_33 = arith.constant 0 : index
      %35 = vector.load %arg10[%c0_32, %c0_33] : memref<2x1xf32, #tpu.memory_space<vmem>>, vector<2x1xf32>
      %cst_34 = arith.constant 1.000000e+00 : f32
      %36 = vector.broadcast %cst_34 : f32 to vector<2x1xf32>
      %37 = arith.maximumf %35, %36 : vector<2x1xf32>
      %38 = vector.broadcast %37 : vector<2x1xf32> to vector<2x32xf32>
      %39 = arith.divf %34, %38 : vector<2x32xf32>
      %c0_35 = arith.constant 0 : index
      %c0_36 = arith.constant 0 : index
      %40 = vector.load %arg3[%c0_35, %c0_36] : memref<32x64xf32, #tpu.memory_space<vmem>>, vector<32x64xf32>
      %cst_37 = arith.constant dense<0.000000e+00> : vector<2x64xf32>
      %41 = tpu.matmul %39, %40, %cst_37 {dimension_numbers = #tpu.dot_dimension_numbers<[1], [0], [0], [1], [0, 0, 1, 1], [], []>} : vector<2x32xf32>, vector<32x64xf32>, vector<2x64xf32> -> vector<2x64xf32>
      %c0_38 = arith.constant 0 : index
      %c0_39 = arith.constant 0 : index
      %42 = vector.load %arg4[%c0_38, %c0_39] : memref<1x64xf32, #tpu.memory_space<vmem>>, vector<1x64xf32>
      %43 = vector.broadcast %42 : vector<1x64xf32> to vector<2x64xf32>
      %44 = arith.addf %41, %43 : vector<2x64xf32>
      %45 = math.tanh %44 : vector<2x64xf32>
      %c0_40 = arith.constant 0 : index
      %c0_41 = arith.constant 0 : index
      %46 = vector.load %arg6[%c0_40, %c0_41] : memref<2x64xf32, #tpu.memory_space<vmem>>, vector<2x64xf32>
      tpu.vector_store %arg6[%c0_40, %c0_41], %45 {strides = array<i32>} : memref<2x64xf32, #tpu.memory_space<vmem>>, vector<2x64xf32>,
      %c0_42 = arith.constant 0 : index
      %c0_43 = arith.constant 0 : index
      %47 = vector.load %arg11[%c0_42, %c0_43] : memref<2x32xf32, #tpu.memory_space<vmem>>, vector<2x32xf32>
      %cst_44 = arith.constant 1.250000e-01 : f32
      %48 = vector.broadcast %cst_44 : f32 to vector<2x32xf32>
      %49 = arith.mulf %47, %48 : vector<2x32xf32>
      %c0_45 = arith.constant 0 : index
      %c0_46 = arith.constant 0 : index
      %50 = vector.load %arg7[%c0_45, %c0_46] : memref<2x32xf32, #tpu.memory_space<vmem>>, vector<2x32xf32>
      tpu.vector_store %arg7[%c0_45, %c0_46], %49 {strides = array<i32>} : memref<2x32xf32, #tpu.memory_space<vmem>>, vector<2x32xf32>,
    } else {
    }
    return
  }
  func.func @transform_0(%arg0: i32) -> (i32, i32, i32) {
    %c0_i32 = arith.constant 0 : i32
    %c0_i32_0 = arith.constant 0 : i32
    %c0_i32_1 = arith.constant 0 : i32
    return %c0_i32, %arg0, %c0_i32_0 : i32, i32, i32
  }
  func.func @transform_1(%arg0: i32) -> (i32, i32) {
    %c0_i32 = arith.constant 0 : i32
    %c0_i32_0 = arith.constant 0 : i32
    return %c0_i32, %arg0 : i32, i32
  }
  func.func @transform_2(%arg0: i32) -> (i32, i32) {
    %c0_i32 = arith.constant 0 : i32
    %c0_i32_0 = arith.constant 0 : i32
    %c0_i32_1 = arith.constant 0 : i32
    return %c0_i32, %c0_i32_0 : i32, i32
  }
  func.func @transform_3(%arg0: i32) -> (i32, i32) {
    %c0_i32 = arith.constant 0 : i32
    %c0_i32_0 = arith.constant 0 : i32
    %c0_i32_1 = arith.constant 0 : i32
    return %c0_i32, %c0_i32_0 : i32, i32
  }
  func.func @transform_4(%arg0: i32) -> (i32, i32) {
    %c0_i32 = arith.constant 0 : i32
    %c0_i32_0 = arith.constant 0 : i32
    %c0_i32_1 = arith.constant 0 : i32
    return %c0_i32, %c0_i32_0 : i32, i32
  }
  func.func @transform_5(%arg0: i32) -> (i32, i32) {
    %c0_i32 = arith.constant 0 : i32
    %c0_i32_0 = arith.constant 0 : i32
    %c0_i32_1 = arith.constant 0 : i32
    return %c0_i32, %c0_i32_0 : i32, i32
  }
  func.func @transform_6(%arg0: i32) -> (i32, i32) {
    %c0_i32 = arith.constant 0 : i32
    %c0_i32_0 = arith.constant 0 : i32
    %c0_i32_1 = arith.constant 0 : i32
    return %c0_i32, %c0_i32_0 : i32, i32
  }
  func.func @transform_7(%arg0: i32) -> (i32, i32, i32) {
    %c0_i32 = arith.constant 0 : i32
    %c0_i32_0 = arith.constant 0 : i32
    %c0_i32_1 = arith.constant 0 : i32
    return %c0_i32, %arg0, %c0_i32_0 : i32, i32, i32
  }
}

</mosaic_0001>

<bundles_post_ra>
// kernel: tpu_custom_call.1
= control target key start
LH: loop header
LB: loop body
LE: loop exit
PB: predicated region body
PF: predicated region fallthrough
CT: control target
= control target key end

     0   :  { %13 = vsyncpa [#allocation6], 0  ;;  %s690_s0 = inlined_call_operand.hbm [shape: f32[2,8,32], index: 0, kind: input, shape index: {}]   ;;  %s691_s1 = inlined_call_operand.vmem [shape: f32[2,8], index: 1, kind: input, shape index: {}]   ;;  %s692_s2 = inlined_call_operand.vmem [shape: f32[32,64], index: 2, kind: input, shape index: {}]   ;;  %s693_s3 = inlined_call_operand.vmem [shape: f32[1,64], index: 3, kind: input, shape index: {}]   ;;  %s694_s4 = inlined_call_operand.vmem [shape: f32[32,8], index: 4, kind: input, shape index: {}]   ;;  %s695_s5 = inlined_call_operand.hbm [shape: f32[2,64], index: 5, kind: output, shape index: {0}]   ;;  %s696_s6 = inlined_call_operand.hbm [shape: f32[2,32], index: 6, kind: output, shape index: {1}]   ;;  %s697_s7 = inlined_call_operand.hbm [shape: f32[2,8,8], index: 7, kind: output, shape index: {2}]  }
   0x1   :  { %14 = vsyncpa [#allocation7], 0 }
   0x2   :  { %15 = vsyncpa [#allocation10], 0  ;;  %s536_s24 = smov [#allocation5]   ;;  %s442_s28 = scalar_lea.hbm %s690_s0, 256 }
   0x3   :  { %s21_s25 = sshll.u32 %s536_s24, 4  ;;  %p443_p0 = scmp.ne.s32.totalorder %s690_s0, %s442_s28  ;;  %s22_s25 = int_to_ptr.vmem [resolvable:$true] %s21_s25 }
   0x4   :  { %p446_p1 = scmp.lt.u32.totalorder %s442_s28, %s690_s0 }
   0x6   :  { %p448_p2 = pnand %p446_p1, %p443_p0 }
   0x8   :  { %451 = shalt.err (!%p448_p2)
}
   0x9   :  { %s452_s10 = scalar_lea.vmem %s22_s25, 256  ;;  %p457_p4 = scmp.lt.s32.totalorder %s22_s25, %s22_s25 }
   0xa   :  { %p453_p3 = scmp.ne.s32.totalorder %s22_s25, %s452_s10  ;;  %p458_p5 = scmp.lt.s32.totalorder %s452_s10, %s452_s10 }
   0xc   :  { %p459_p6 = por %p458_p5, %p457_p4 }
   0xe   :  { %p460_p7 = pnand %p459_p6, %p453_p3 }
  0x10   :  { %463 = shalt.err (!%p460_p7)
}
  0x11   :  { %s537_s11 = smov 128   ;;  %s538_s12 = smov 8  }
  0x12   :  { %27 = dma.hbm_to_vmem [thread:$0]  %s690_s0, 256, %s22_s25, [#allocation6], %s537_s11, %s537_s11, %s538_s12  }
  0x13   :  { %530 = dma.done.wait [#allocation6], 256  }
  0x14   :  { %531 = vsyncadd [#allocation6], 4294967040  ;;  %vm43_vm0 = vcmask 254976   ;;  %vm45_vm1 = vcmask 1024   ;;  %v539_v0 = vmov 0.0   ;;  %vm92_vm2 = vcmask 58368  }
  0x15   :  { %44 = vst.msk [vmem:[#allocation2] sm:$0x3] %vm43_vm0, %v539_v0  ;;  %47 = vst.msk [vmem:[#allocation4] sm:$0x3] %vm43_vm0, %v539_v0  ;;  %v50_v1 = vld [vmem:[%s691_s1] sm:$0x3]  ;;  %v52_v3 = vlaneseq }
  0x16   :  { %46 = vst.msk [vmem:[#allocation3] sm:$0x3] %vm45_vm1, %v539_v0  ;;  %v93_v2 = vsel %vm92_vm2, %v50_v1, 0.0  ;;  %v540_v8 = vmov 0   ;;  %vm68_vm3 = vcmask 261120   ;;  %v49_v10 = vld [vmem:[#allocation5 + $0x8] sm:$0xff] }
  0x17   :  { %94 = vadd.xlane.f32.xlu0 %v93_v2  ;;  %v53_v4 = vshrl.u32 %v52_v3, 7  ;;  %428 = vset.pattern.permute.xlu1 %v540_v8  ;;  %v48_v11 = vld [vmem:[#allocation5] sm:$0xff]  ;;  %v107_v12 = vsel %vm68_vm3, %v49_v10, 0.0  ;;  %v122_v22 = vld [vmem:[%s694_s4 + $0x10] sm:$0xff]  ;;  %v123_v23 = vld [vmem:[%s694_s4 + $0x18] sm:$0xff]  ;;  %vm85_vm4 = vcmask 1041409  }
  0x18   :  { %429 = vset.pattern.permute.xlu0 %v540_v8  ;;  %390 = vmatprep.mubr.msk.f32.mxu0 %vm68_vm3, %v48_v11  ;;  %v108_v13 = vrot.slane %v107_v12, 4  ;;  %v100_v16 = vsel %vm68_vm3, %v48_v11, 0.0  ;;  %v120_v17 = vld [vmem:[%s694_s4] sm:$0xff]  ;;  %v121_v18 = vld [vmem:[%s694_s4 + $0x8] sm:$0xff]  ;;  %v408_v24 = vpack.c.bf16 %v123_v23, %v122_v22  ;;  %v235_v56 = vld [vmem:[%s692_s2 + $0x10] sm:$0xff]  ;;  %v541_v58 = vmov 0.0|0.0  }
  0x19   :  { %v61_v5 = vsub.s32 1, %v53_v4  ;;  %v54_v7 = vsub.s32 0, %v53_v4  ;;  %v101_v20 = vrot.slane %v100_v16, 4  ;;  %v404_v21 = vpack.c.bf16 %v121_v18, %v120_v17  ;;  %v233_v54 = vld [vmem:[%s692_s2] sm:$0xff]  ;;  %v234_v55 = vld [vmem:[%s692_s2 + $0x8] sm:$0xff]  ;;  %412 = vmatprep.subr.bf16.mxu1 %v541_v58  ;;  %v236_v60 = vld [vmem:[%s692_s2 + $0x18] sm:$0xff] }
  0x1a   :  { %v109_v14 = vadd.f32 %v108_v13, %v107_v12  ;;  %v413_v59 = vpack.c.bf16 %v234_v55, %v233_v54  ;;  %vm542_vm5 = vmmov 0   ;;  %v416_v63 = vpack.c.bf16 %v236_v60, %v235_v56  ;;  %s543_s2 = smov [#allocation9]  }
  0x1b   :  { %v62_v6 = vrot.slane %v50_v1, %v61_v5  ;;  %v55_v9 = vrot.slane %v50_v1, %v54_v7  ;;  %v102_v25 = vadd.f32 %v101_v20, %v100_v16  ;;  %405 = vmatprep.subr.bf16.mxu0 %v404_v21  ;;  %401 = vmatprep.mubr.msk.f32.mxu1 %vm542_vm5, %v539_v0  ;;  %s339_s30 = sshll.u32 %s543_s2, 4  ;;  %s340_s30 = int_to_ptr.vmem [resolvable:$true] %s339_s30 }
  0x1c   :  { %v110_v15 = vrot.slane %v109_v14, 2  ;;  %407 = vmatpush3.bf16.msra.mxu0 %v404_v21  ;;  %v99_v31 = vld [vmem:[#allocation4] sm:$0x3]  ;;  %414 = vmatpush3.bf16.msra.mxu1 %v413_v59  ;;  %v51_v1 = vld [vmem:[#allocation2] sm:$0x3]  ;;  %s464_s8 = scalar_lea.vmem %s340_s30, 32  ;;  %p469_p9 = scmp.lt.s32.totalorder %s340_s30, %s340_s30 }
  0x1d   :  { %64 = vbcast.lane.b32.xlu1 %v62_v6, 256  ;;  %v103_v27 = vrot.slane %v102_v25, 2  ;;  %409 = vmatprep.subr.bf16.mxu0 %v408_v24  ;;  %v91_v39 = vld [vmem:[#allocation3] sm:$0x3]  ;;  %p465_p8 = scmp.ne.s32.totalorder %s340_s30, %s464_s8  ;;  %p470_p10 = scmp.lt.s32.totalorder %s464_s8, %s464_s8 }
  0x1e   :  { %v111_v19 = vadd.f32 %v110_v15, %v109_v14  ;;  %415 = vmatprep.subr.bf16.mxu1 %v541_v58 }
  0x1f   :  { %v104_v28 = vadd.f32 %v103_v27, %v102_v25  ;;  %p471_p11 = por %p470_p10, %p469_p9 }
  0x20   :  { %v112_v26 = vrot.slane %v111_v19, 1  ;;  %411 = vmatpush3.bf16.msra.mxu0 %v408_v24  ;;  %417 = vmatpush3.bf16.msra.mxu1 %v416_v63 }
  0x21   :  { %v105_v30 = vrot.slane %v104_v28, 1  ;;  %p472_p12 = pnand %p471_p11, %p465_p8 }
  0x22   :  { %v113_v29 = vadd.f32 %v112_v26, %v111_v19 }
  0x23   :  { %v106_v32 = vadd.f32 %v105_v30, %v104_v28  ;;  %391 = vmatmul.mubr.msk.f32.vlgmr.msra.gmra.mrb[0].mxu0 %vm68_vm3, %v49_v10 }
  0x25   :  { %v116_v33 = vsel %vm85_vm4, %v113_v29, %v106_v32 }
  0x26   :  { %v118_v34 = vadd.f32 %v116_v33, %v99_v31 }
  0x28   :  { %119 = vst.msk [vmem:[#allocation4] sm:$0x3] %vm43_vm0, %v118_v34 }
  0x2d   :  { %57 = vbcast.lane.b32.xlu0 %v55_v9, 256 }
  0x2f   :  { %v320_v18 = vld [vmem:[#allocation4] sm:$0x3] }
  0x30   :  { %v321_v19 = vmul.f32 0.125, %v320_v18 }
  0x32   :  { %322 = vst.msk [vmem:[#allocation9] sm:$0x3] %vm43_vm0, %v321_v19 }
  0x8f   :  { %v65_v35 = vpop.permute.xlu1 %64 }
  0x90   :  { %v67_v36 = vmul.f32 %v65_v35, %v49_v10 }
  0x92   :  { %v76_v37 = vsel %vm68_vm3, %v67_v36, 0.0 }
  0x93   :  { %v77_v38 = vrot.slane %v76_v37, 4 }
  0x95   :  { %v78_v41 = vadd.f32 %v77_v38, %v76_v37 }
  0x97   :  { %v79_v43 = vrot.slane %v78_v41, 2 }
  0x99   :  { %v80_v47 = vadd.f32 %v79_v43, %v78_v41 }
  0x9b   :  { %v81_v52 = vrot.slane %v80_v47, 1 }
  0x9d   :  { %v82_v61 = vadd.f32 %v81_v52, %v80_v47 }
  0xa4   :  { %v95_v40 = vpop.xlane.xlu0 %94 }
  0xa5   :  { %v96_v42 = vadd.f32 %v95_v40, %v91_v39 }
  0xa7   :  { %98 = vst.msk [vmem:[#allocation3] sm:$0x3] %vm45_vm1, %v96_v42 }
  0xa8   :  { %v58_v44 = vpop.permute.xlu0 %57 }
  0xa9   :  { %v66_v45 = vmul.f32 %v58_v44, %v48_v11 }
  0xab   :  { %v69_v46 = vsel %vm68_vm3, %v66_v45, 0.0 }
  0xac   :  { %v70_v48 = vrot.slane %v69_v46, 4 }
  0xae   :  { %v224_v49 = vld [vmem:[#allocation3] sm:$0x3]  ;;  %v71_v50 = vadd.f32 %v70_v48, %v69_v46 }
  0xaf   :  { %v225_v51 = vmax.f32 %v224_v49, 1.0 }
  0xb0   :  { %v72_v53 = vrot.slane %v71_v50, 2 }
  0xb1   :  { %228 = vperm.xlu1 %428, %v225_v51  }
  0xb2   :  { %v73_v57 = vadd.f32 %v72_v53, %v71_v50 }
  0xb4   :  { %v74_v62 = vrot.slane %v73_v57, 1 }
  0xb6   :  { %v75_v2 = vadd.f32 %v74_v62, %v73_v57 }
  0xb8   :  { %v86_v3 = vsel %vm85_vm4, %v82_v61, %v75_v2 }
  0xb9   :  { %v88_v4 = vadd.f32 %v86_v3, %v51_v1 }
  0xbb   :  { %90 = vst.msk [vmem:[#allocation2] sm:$0x3] %vm43_vm0, %v88_v4 }
  0xc2   :  { %v223_v9 = vld [vmem:[#allocation2] sm:$0x3] }
  0xf6   :  { %v392_v5 = vpop.f32.mrb[0].mxu0 }
  0xf7   :  { %v196_v6 = vpop.f32.mrb[1].mxu0  ;;  %v206_v10 = vsub.f32 0.0, %v392_v5 }
  0xf8   :  { %v205_v11 = vsub.f32 0.0, %v196_v6 }
  0xf9   :  { %v209_v12 = vmul.f32 1.442695, %v206_v10 }
  0xfa   :  { %v207_v13 = vmul.f32 1.442695, %v205_v11 }
 0x130   :  { %v229_v7 = vpop.permute.xlu1 %228 }
 0x131   :  { %430 = vrcp.f32 %v229_v7 }
 0x132   :  { %432 = vpow2.f32 %v209_v12 }
 0x133   :  { %434 = vpow2.f32 %v207_v13 }
 0x13b   :  { %v431_v8 = vpop.eup %430 }
 0x13c   :  { %v232_v0 = vmul.f32 %v431_v8, %v223_v9  ;;  %v433_v14 = vpop.eup %432 }
 0x13d   :  { %v435_v15 = vpop.eup %434  ;;  %v212_v16 = vadd.f32 1.0, %v433_v14 }
 0x13e   :  { %402 = vmatmul.mubr.msk.f32.vlgmr.msra.gmra.mrb[0].mxu1 %vm68_vm3, %v232_v0  ;;  %v211_v17 = vadd.f32 1.0, %v435_v15 }
 0x13f   :  { %436 = vrcp.f32 %v212_v16 }
 0x140   :  { %438 = vrcp.f32 %v211_v17 }
 0x141   :  { %475 = shalt.err (!%p472_p12)
}
 0x142   :  { %s476_s13 = scalar_lea.hbm %s696_s6, 32 }
 0x143   :  { %p477_p13 = scmp.ne.s32.totalorder %s696_s6, %s476_s13  ;;  %p480_p0 = scmp.lt.u32.totalorder %s476_s13, %s696_s6 }
 0x145   :  { %p482_p1 = pnand %p480_p0, %p477_p13 }
 0x147   :  { %485 = shalt.err (!%p482_p1)
}
 0x148   :  { %342 = dma.vmem_to_hbm [thread:$0]  %s340_s30, 32, %s696_s6, [#allocation10]   ;;  %vm217_vm6 = vcmask 64512  }
 0x149   :  { %v437_v20 = vpop.eup %436  ;;  %s544_s18 = smov [#allocation11]  }
 0x14a   :  { %v439_v21 = vpop.eup %438  ;;  %219 = vst.msk [vmem:[#allocation11 + $0x8] sm:$0xff] %vm217_vm6, %v437_v20  ;;  %s348_s19 = sshll.u32 %s544_s18, 4  ;;  %s349_s19 = int_to_ptr.vmem [resolvable:$true] %s348_s19 }
 0x14b   :  { %218 = vst.msk [vmem:[#allocation11] sm:$0xff] %vm217_vm6, %v439_v21  ;;  %s486_s20 = scalar_lea.vmem %s349_s19, 256  ;;  %p491_p3 = scmp.lt.s32.totalorder %s349_s19, %s349_s19 }
 0x14c   :  { %p487_p2 = scmp.ne.s32.totalorder %s349_s19, %s486_s20  ;;  %p492_p4 = scmp.lt.s32.totalorder %s486_s20, %s486_s20 }
 0x14e   :  { %p493_p5 = por %p492_p4, %p491_p3 }
 0x150   :  { %p494_p6 = pnand %p493_p5, %p487_p2 }
 0x152   :  { %497 = shalt.err (!%p494_p6)
}
 0x153   :  { %s498_s4 = scalar_lea.hbm %s697_s7, 256 }
 0x154   :  { %p499_p7 = scmp.ne.s32.totalorder %s697_s7, %s498_s4  ;;  %p502_p8 = scmp.lt.u32.totalorder %s498_s4, %s697_s7 }
 0x156   :  { %p504_p9 = pnand %p502_p8, %p499_p7 }
 0x158   :  { %507 = shalt.err (!%p504_p9)
}
 0x159   :  { %354 = dma.vmem_to_hbm [thread:$0]  %s349_s19, 256, %s697_s7, [#allocation10], %s537_s11, %s537_s11, %s538_s12   ;;  %vm318_vm7 = vcmask 517120  }
 0x15a   :  { %v369_v22 = vld [vmem:[%s693_s3] ss:$0 sm:$0xff]  ;;  %s545_s2 = smov [#allocation8]  }
 0x15b   :  { %s329_s30 = sshll.u32 %s545_s2, 4  ;;  %s330_s30 = int_to_ptr.vmem [resolvable:$true] %s329_s30 }
 0x15c   :  { %s508_s8 = scalar_lea.vmem %s330_s30, 32  ;;  %p513_p11 = scmp.lt.s32.totalorder %s330_s30, %s330_s30 }
 0x15d   :  { %p509_p10 = scmp.ne.s32.totalorder %s330_s30, %s508_s8  ;;  %p514_p12 = scmp.lt.s32.totalorder %s508_s8, %s508_s8 }
 0x15f   :  { %p515_p13 = por %p514_p12, %p513_p11 }
 0x161   :  { %p516_p0 = pnand %p515_p13, %p509_p10 }
 0x211   :  { %v313_v23 = vpop.f32.mrb[0].mxu1 }
 0x212   :  { %v314_v24 = vadd.f32 %v369_v22, %v313_v23  ;;  %v403_v25 = vpop.f32.mrb[1].mxu1 }
 0x214   :  { %440 = vtanh.f32 %v314_v24 }
 0x21e   :  { %v441_v26 = vpop.eup %440 }
 0x21f   :  { %319 = vst.msk [vmem:[#allocation8] sm:$0x3] %vm318_vm7, %v441_v26 }
 0x220   :  { %519 = shalt.err (!%p516_p0)
}
 0x221   :  { %s520_s3 = scalar_lea.hbm %s695_s5, 32 }
 0x222   :  { %p521_p1 = scmp.ne.s32.totalorder %s695_s5, %s520_s3  ;;  %p524_p2 = scmp.lt.u32.totalorder %s520_s3, %s695_s5 }
 0x224   :  { %p526_p3 = pnand %p524_p2, %p521_p1 }
 0x226   :  { %529 = shalt.err (!%p526_p3)
}
 0x227   :  { %332 = dma.vmem_to_hbm [thread:$0]  %s330_s30, 32, %s695_s5, [#allocation7]  }
 0x228   :  { %532 = dma.done.wait [#allocation7], 32  }
 0x229   :  { %533 = vsyncadd [#allocation7], 4294967264 }
 0x22a   :  { %534 = dma.done.wait [#allocation10], 288  }
 0x22b   :  { %535 = vsyncadd [#allocation10], 4294967008 }
 0x22c   :  { %364 = vsyncpa [#allocation6], 1 }
 0x22d   :  { %365 = vsyncpa [#allocation7], 1 }
 0x22e   :  { %366 = vsyncpa [#allocation10], 1 }

</bundles_post_ra>
